<compile_context>
chip_gen: v5e
topology: v5e:2x2
jax: 0.10.0
libtpu: 0.0.40
codegen_flags: <defaults>
</compile_context>

<pallas_src>
import functools
import math

import jax
import jax.numpy as jnp
from jax import lax
from jax.experimental import pallas as pl
from jax.experimental.pallas import tpu as pltpu


def _pick_tile(dim, candidates):
    """Largest candidate tile that evenly divides `dim`; else the full dim
    (a full-extent block is always a legal TPU block shape)."""
    for c in candidates:
        if dim >= c and dim % c == 0:
            return c
    return dim


@functools.lru_cache(maxsize=None)
def _vmem_budget_bytes():
    """Chip-aware scoped-VMEM budget: ~3/4 of physical VMEM, capped at 96 MiB.
    -> ~96 MiB on v5e/v6e (128 MiB VMEM), ~48 MiB on v7x (64 MiB VMEM)."""
    cap = 128 * 1024 * 1024
    try:
        info = pltpu.get_tpu_info()
        cap = int(getattr(info, "vmem_capacity_bytes", cap))
    except Exception:
        cap = 64 * 1024 * 1024          # conservative fallback
    return int(min((cap * 3) // 4, 96 * 1024 * 1024))


# ---------------------------------------------------------------------------
# Tiled linear:  y = x @ w_t + b   (bf16 operands, f32 accumulation)
# ---------------------------------------------------------------------------

def _linear_kernel(x_ref, w_ref, b_ref, o_ref, acc_ref):
    kk = pl.program_id(2)

    @pl.when(kk == 0)
    def _init():
        acc_ref[...] = jnp.zeros(acc_ref.shape, jnp.float32)

    acc_ref[...] += jnp.dot(x_ref[...], w_ref[...],
                            preferred_element_type=jnp.float32)

    @pl.when(kk == pl.num_programs(2) - 1)
    def _finalize():
        # bias (kept in f32) added exactly once, on the last K step
        o_ref[...] = (acc_ref[...] + b_ref[...].astype(jnp.float32)
                      ).astype(o_ref.dtype)


def linear(x, w_t, b, out_dtype=None):
    """y = x @ w_t + b, tiled over (rows, cols, K) with f32 accumulation."""
    N, K = x.shape
    M = w_t.shape[1]
    out_dtype = x.dtype if out_dtype is None else out_dtype
    tm = _pick_tile(N, (512, 256, 128, 64, 32, 16, 8))
    tn = _pick_tile(M, (512, 256, 128))           # fill the 256-wide MXU
    tk = _pick_tile(K, (512, 256, 128))
    grid = (N // tm, M // tn, K // tk)
    return pl.pallas_call(
        _linear_kernel,
        out_shape=jax.ShapeDtypeStruct((N, M), out_dtype),
        grid=grid,
        in_specs=[
            pl.BlockSpec((tm, tk), lambda i, j, k: (i, k)),
            pl.BlockSpec((tk, tn), lambda i, j, k: (k, j)),
            pl.BlockSpec((1, tn), lambda i, j, k: (0, j)),
        ],
        out_specs=pl.BlockSpec((tm, tn), lambda i, j, k: (i, j)),
        scratch_shapes=[pltpu.VMEM((tm, tn), jnp.float32)],
        compiler_params=pltpu.CompilerParams(
            dimension_semantics=("parallel", "parallel", "arbitrary"),
            vmem_limit_bytes=_vmem_budget_bytes()),
    )(x, w_t, b.reshape(1, M))


# ---------------------------------------------------------------------------
# Flash-style attention over the fused QKV activation
# ---------------------------------------------------------------------------

def _attn_kernel_headgrid(q_ref, k_ref, v_ref, o_ref, m_sc, l_sc, acc_sc):
    """One (batch, head) pair per grid point; D is lane-aligned (D % 128 == 0)."""
    ki = pl.program_id(3)

    @pl.when(ki == 0)
    def _init():
        m_sc[...] = jnp.full(m_sc.shape, -jnp.inf, jnp.float32)
        l_sc[...] = jnp.zeros(l_sc.shape, jnp.float32)
        acc_sc[...] = jnp.zeros(acc_sc.shape, jnp.float32)

    q = q_ref[...]                       # (tq, D); 1/sqrt(D) pre-folded into q
    k = k_ref[...]                       # (tk, D)
    v = v_ref[...]                       # (tk, D)
    # q @ k^T with k in natural layout: contract the head dim of both.
    s = lax.dot_general(q, k, (((1,), (1,)), ((), ())),
                        preferred_element_type=jnp.float32)        # (tq, tk)
    m_prev = m_sc[...]
    m_new = jnp.maximum(m_prev, jnp.max(s, axis=-1, keepdims=True))
    alpha = jnp.exp(m_prev - m_new)
    p = jnp.exp(s - m_new)
    l_sc[...] = alpha * l_sc[...] + jnp.sum(p, axis=-1, keepdims=True)
    m_sc[...] = m_new
    pv = jnp.dot(p.astype(v.dtype), v, preferred_element_type=jnp.float32)
    acc_sc[...] = alpha * acc_sc[...] + pv

    @pl.when(ki == pl.num_programs(3) - 1)
    def _finalize():
        inv_l = pl.reciprocal(l_sc[...], approx=False)   # exact; once per q tile
        o_ref[0] = (acc_sc[...] * inv_l).astype(o_ref.dtype)


def _attn_kernel_fused(q_ref, k_ref, v_ref, o_ref, m_sc, l_sc, acc_sc, *,
                       num_heads, head_dim):
    """All heads of one batch per grid point (fallback for D % 128 != 0)."""
    ki = pl.program_id(2)

    @pl.when(ki == 0)
    def _init():
        m_sc[...] = jnp.full(m_sc.shape, -jnp.inf, jnp.float32)
        l_sc[...] = jnp.zeros(l_sc.shape, jnp.float32)
        acc_sc[...] = jnp.zeros(acc_sc.shape, jnp.float32)

    q = q_ref[...]                          # (tq, H*D); scale pre-folded
    k = k_ref[...]                          # (tk, H*D)
    v = v_ref[...]                          # (tk, H*D)

    for h in range(num_heads):              # static unroll over heads
        lo, hi = h * head_dim, (h + 1) * head_dim
        qh, kh, vh = q[:, lo:hi], k[:, lo:hi], v[:, lo:hi]
        s = lax.dot_general(qh, kh, (((1,), (1,)), ((), ())),
                            preferred_element_type=jnp.float32)    # (tq, tk)
        m_prev = m_sc[h]                                           # (tq, 1)
        m_new = jnp.maximum(m_prev, jnp.max(s, axis=-1, keepdims=True))
        alpha = jnp.exp(m_prev - m_new)
        p = jnp.exp(s - m_new)
        l_sc[h] = alpha * l_sc[h] + jnp.sum(p, axis=-1, keepdims=True)
        m_sc[h] = m_new
        pv = lax.dot_general(p.astype(vh.dtype), vh,
                             (((1,), (0,)), ((), ())),
                             preferred_element_type=jnp.float32)   # (tq, D)
        acc_sc[h] = alpha * acc_sc[h] + pv

    @pl.when(ki == pl.num_programs(2) - 1)
    def _finalize():
        heads = []
        for h in range(num_heads):
            inv_l = pl.reciprocal(l_sc[h], approx=False)           # (tq, 1)
            heads.append(acc_sc[h] * inv_l)                        # (tq, D)
        o_ref[0] = jnp.concatenate(heads, axis=-1).astype(o_ref.dtype)


def attention(qkv2d, *, batch, seq, num_heads, head_dim, out_dtype):
    """qkv2d: (S, B*3*C) row-major view of the fused QKV projection; row = s,
    columns laid out as (b, {q,k,v}, h, d).  Returns (B, S, C) with
    out[b, s, h*D+d] == per-head attention output (torch's transpose(1,2)
    contiguous layout, so the following reshape to (S, B, C) is free)."""
    B, S, H, D = batch, seq, num_heads, head_dim
    C = H * D
    # TODO(synk): add a fallback slicing path for out_channels % 128 != 0
    # (the column-slab index_map trick needs 128-lane-aligned column strides).
    assert C % 128 == 0, "attention kernel requires out_channels % 128 == 0"
    budget = _vmem_budget_bytes()

    if D % 128 == 0:
        # --- head-on-grid path: every block is lane-aligned, no head slicing.
        tq = _pick_tile(S, (256, 128, 64, 32, 16, 8))
        tk = _pick_tile(S, (512, 256, 128, 64, 32, 16, 8))
        grid = (B, H, S // tq, S // tk)
        # NOTE: if profiling shows exposed K/V DMA, add
        # pipeline_mode=pl.Buffered(3) on the K/V specs (VMEM budget allowing).
        return pl.pallas_call(
            _attn_kernel_headgrid,
            out_shape=jax.ShapeDtypeStruct((B, S, C), out_dtype),
            grid=grid,
            in_specs=[
                pl.BlockSpec((tq, D), lambda b, h, qi, ki: (qi, (b * 3 + 0) * H + h)),
                pl.BlockSpec((tk, D), lambda b, h, qi, ki: (ki, (b * 3 + 1) * H + h)),
                pl.BlockSpec((tk, D), lambda b, h, qi, ki: (ki, (b * 3 + 2) * H + h)),
            ],
            out_specs=pl.BlockSpec((1, tq, D), lambda b, h, qi, ki: (b, qi, h)),
            scratch_shapes=[
                pltpu.VMEM((tq, 1), jnp.float32),   # running max  m
                pltpu.VMEM((tq, 1), jnp.float32),   # running sum  l
                pltpu.VMEM((tq, D), jnp.float32),   # output accumulator
            ],
            compiler_params=pltpu.CompilerParams(
                dimension_semantics=("parallel", "parallel", "parallel",
                                     "arbitrary"),
                vmem_limit_bytes=budget),
        )(qkv2d, qkv2d, qkv2d)

    # --- fused-head path (D not 128-aligned): all heads of a batch per step.
    # tq/tk capped so per-head (tq,tk) f32 score temporaries stay small
    # (bounds register/VMEM spill from the static head unroll).
    tq = _pick_tile(S, (128, 64, 32, 16, 8))
    tk = _pick_tile(S, (256, 128, 64, 32, 16, 8))
    grid = (B, S // tq, S // tk)
    kernel = functools.partial(_attn_kernel_fused, num_heads=H, head_dim=D)
    return pl.pallas_call(
        kernel,
        out_shape=jax.ShapeDtypeStruct((B, S, C), out_dtype),
        grid=grid,
        in_specs=[
            pl.BlockSpec((tq, C), lambda b, qi, ki: (qi, b * 3 + 0)),  # Q
            pl.BlockSpec((tk, C), lambda b, qi, ki: (ki, b * 3 + 1)),  # K
            pl.BlockSpec((tk, C), lambda b, qi, ki: (ki, b * 3 + 2)),  # V
        ],
        out_specs=pl.BlockSpec((1, tq, C), lambda b, qi, ki: (b, qi, 0)),
        scratch_shapes=[
            pltpu.VMEM((H, tq, 1), jnp.float32),   # running max  m
            pltpu.VMEM((H, tq, 1), jnp.float32),   # running sum  l
            pltpu.VMEM((H, tq, D), jnp.float32),   # output accumulator
        ],
        compiler_params=pltpu.CompilerParams(
            dimension_semantics=("parallel", "parallel", "arbitrary"),
            vmem_limit_bytes=budget),
    )(qkv2d, qkv2d, qkv2d)


# ---------------------------------------------------------------------------
# Module wrapper
# ---------------------------------------------------------------------------

def init_params(key, in_channels, out_channels):
    k1, k2, k3, k4 = jax.random.split(key, 4)
    s_in = 1.0 / math.sqrt(in_channels)
    s_out = 1.0 / math.sqrt(out_channels)
    return {
        # stored already transposed: (in, out)
        "w_qkv_t": jax.random.normal(k1, (in_channels, 3 * out_channels),
                                     jnp.float32) * s_in,
        "b_qkv": jax.random.normal(k2, (3 * out_channels,), jnp.float32) * s_in,
        "w_out_t": jax.random.normal(k3, (out_channels, out_channels),
                                     jnp.float32) * s_out,
        "b_out": jax.random.normal(k4, (out_channels,), jnp.float32) * s_out,
    }


def prepare_params(params, num_heads, out_channels, compute_dtype=jnp.bfloat16):
    """One-time parameter transform: fold 1/sqrt(head_dim) into the Q columns
    of the QKV projection and cast matmul weights to the MXU compute dtype.
    Biases stay f32 (added in f32 inside the kernels)."""
    C = out_channels
    D = C // num_heads
    inv_scale = 1.0 / math.sqrt(D)
    col_scale = jnp.concatenate([jnp.full((C,), inv_scale, jnp.float32),
                                 jnp.ones((2 * C,), jnp.float32)])
    return {
        "w_qkv_t": (params["w_qkv_t"] * col_scale[None, :]).astype(compute_dtype),
        "b_qkv": params["b_qkv"] * col_scale,
        "w_out_t": params["w_out_t"].astype(compute_dtype),
        "b_out": params["b_out"],
    }


def self_attention_forward(x, prepared, num_heads, out_channels,
                           compute_dtype=jnp.bfloat16):
    S, B, Cin = x.shape
    H = num_heads
    C = out_channels
    D = C // H

    # Fused QKV projection (Pallas, tiled).  Rows are ordered (s, b);
    # bf16 operands, f32 accumulation, bf16 activation out.
    xc = x.reshape(S * B, Cin).astype(compute_dtype)
    qkv = linear(xc, prepared["w_qkv_t"], prepared["b_qkv"],
                 out_dtype=compute_dtype)

    # Free row-major view: row s, columns laid out as (b, {q,k,v}, h, d).
    # The attention BlockSpecs pick the per-(batch[,head]) q/k/v column slabs
    # directly, so no HBM transpose of the QKV tensor is ever materialized.
    qkv2d = qkv.reshape(S, B * 3 * C)

    # Flash-style attention (Pallas).  Output layout (B, S, C) is the same
    # contiguous buffer torch produces with (attn @ v).transpose(1, 2).
    o = attention(qkv2d, batch=B, seq=S, num_heads=H, head_dim=D,
                  out_dtype=compute_dtype)

    # torch's .reshape(S, B, -1) is a raw row-major reinterpretation of that
    # buffer; the out_proj acts row-wise, so applying it to the flat rows and
    # reshaping at the end is bit-equivalent.
    out = linear(o.reshape(B * S, C), prepared["w_out_t"], prepared["b_out"],
                 out_dtype=x.dtype)
    return out.reshape(S, B, C)


# ---------------------------------------------------------------------------
# References
# ---------------------------------------------------------------------------

def _reference_forward(x, params, num_heads, out_channels):
    """Pure-JAX f32 reference mirroring the PyTorch module exactly."""
    S, B, Cin = x.shape
    H = num_heads
    D = out_channels // H
    scale = math.sqrt(D)
    qkv = x.reshape(S * B, Cin) @ params["w_qkv_t"] + params["b_qkv"]
    qkv = jnp.transpose(qkv.reshape(S, B, 3, H, D), (2, 1, 3, 0, 4))
    q, k, v = qkv[0], qkv[1], qkv[2]
    attn = jnp.einsum("bhqd,bhkd->bhqk", q, k) / scale
    attn = jax.nn.softmax(attn, axis=-1)
    o = jnp.einsum("bhqk,bhkd->bhqd", attn, v)
    o = jnp.swapaxes(o, 1, 2).reshape(S, B, H * D)
    out = o.reshape(S * B, H * D) @ params["w_out_t"] + params["b_out"]
    return out.reshape(S, B, out_channels)


def _mirror_forward(x, prepared, num_heads, out_channels,
                    compute_dtype=jnp.bfloat16):
    """Pure-JAX mirror of the exact kernel arithmetic (same bf16 cast points,
    folded scale, f32 accumulation, unnormalized P@V then 1/l).  Used for a
    tight numerical check of the Pallas implementation."""
    S, B, Cin = x.shape
    H = num_heads
    C = out_channels
    D = C // H
    cdt = compute_dtype
    xc = x.reshape(S * B, Cin).astype(cdt)
    qkv = (jnp.dot(xc, prepared["w_qkv_t"],
                   preferred_element_type=jnp.float32)
           + prepared["b_qkv"]).astype(cdt)
    qkv = jnp.transpose(qkv.reshape(S, B, 3, H, D), (2, 1, 3, 0, 4))
    q, k, v = qkv[0], qkv[1], qkv[2]          # (B,H,S,D); scale pre-folded in q
    s = jnp.einsum("bhqd,bhkd->bhqk", q, k,
                   preferred_element_type=jnp.float32)
    m = jnp.max(s, axis=-1, keepdims=True)
    p = jnp.exp(s - m)
    l = jnp.sum(p, axis=-1, keepdims=True)
    pv = jnp.einsum("bhqk,bhkd->bhqd", p.astype(cdt), v,
                    preferred_element_type=jnp.float32)
    o = (pv / l).astype(cdt)
    o = jnp.swapaxes(o, 1, 2).reshape(B * S, C)
    out = (jnp.dot(o, prepared["w_out_t"],
                   preferred_element_type=jnp.float32)
           + prepared["b_out"]).astype(x.dtype)
    return out.reshape(S, B, C)


if __name__ == "__main__":
    key = jax.random.PRNGKey(0)

    # (S, B, in_channels, out_channels, num_heads)
    configs = [
        (8, 2, 128, 128, 4),   # head_dim=32  -> fused-head kernel path
        (8, 2, 128, 256, 2),   # head_dim=128 -> head-on-grid kernel path
    ]
    for (S, B, Cin, C, H) in configs:
        key, kx, kp = jax.random.split(key, 3)
        x = jax.random.normal(kx, (S, B, Cin), jnp.float32)
        params = init_params(kp, Cin, C)
        prepared = prepare_params(params, H, C, compute_dtype=jnp.bfloat16)

        y = self_attention_forward(x, prepared, H, C,
                                   compute_dtype=jnp.bfloat16)
        y = jax.block_until_ready(y)
        assert y.shape == (S, B, C)

        # Tight check: mirror of the exact kernel arithmetic (bf16 operands,
        # f32 accumulation) -- isolates Pallas implementation errors.
        y_mirror = _mirror_forward(x, prepared, H, C, jnp.bfloat16)
        assert jnp.allclose(y, y_mirror, rtol=2e-3, atol=2e-3), \
            "kernel vs. bf16 mirror mismatch"

        # Sanity check: exact f32 PyTorch-module semantics; slack accounts for
        # bf16 operand rounding (outputs are O(1)).
        y_ref = _reference_forward(x, params, H, C)
        assert jnp.allclose(y, y_ref, rtol=2.5e-2, atol=2.5e-2), \
            "kernel vs. f32 reference mismatch"

    print("KERNEL_OK")
</pallas_src>

<mosaic_0001>
module attributes {stable_mosaic.version = 11 : i64} {
  func.func @_linear_kernel(%arg0: i32, %arg1: i32, %arg2: i32, %arg3: memref<16x128xbf16, #tpu.memory_space<vmem>>, %arg4: memref<128x128xbf16, #tpu.memory_space<vmem>>, %arg5: memref<1x128xf32, #tpu.memory_space<vmem>>, %arg6: memref<16x128xbf16, #tpu.memory_space<vmem>>, %arg7: memref<16x128xf32, #tpu.memory_space<vmem>>) attributes {dimension_semantics = [#tpu.dimension_semantics<parallel>, #tpu.dimension_semantics<parallel>, #tpu.dimension_semantics<arbitrary>], iteration_bounds = array<i64: 1, 3, 1>, scalar_prefetch = 0 : i64, scratch_operands = 1 : i64, tpu.core_type = #tpu.core_type<tc>, window_params = [{transform_indices = @transform_0, window_bounds = array<i64: 16, 128>}, {transform_indices = @transform_1, window_bounds = array<i64: 128, 128>}, {transform_indices = @transform_2, window_bounds = array<i64: 1, 128>}, {transform_indices = @transform_3, window_bounds = array<i64: 16, 128>}]} {
    %c0_i32 = arith.constant 0 : i32
    %0 = arith.cmpi eq, %arg2, %c0_i32 : i32
    %1 = arith.extui %0 : i1 to i32
    %c0_i32_0 = arith.constant 0 : i32
    %2 = arith.cmpi ne, %1, %c0_i32_0 : i32
    scf.if %2 {
      %cst_10 = arith.constant 0.000000e+00 : f32
      %12 = vector.broadcast %cst_10 : f32 to vector<16x128xf32>
      %c0_11 = arith.constant 0 : index
      %c0_12 = arith.constant 0 : index
      %13 = vector.load %arg7[%c0_11, %c0_12] : memref<16x128xf32, #tpu.memory_space<vmem>>, vector<16x128xf32>
      tpu.vector_store %arg7[%c0_11, %c0_12], %12 {strides = array<i32>} : memref<16x128xf32, #tpu.memory_space<vmem>>, vector<16x128xf32>,
    } else {
    }
    %c0 = arith.constant 0 : index
    %c0_1 = arith.constant 0 : index
    %3 = vector.load %arg7[%c0, %c0_1] : memref<16x128xf32, #tpu.memory_space<vmem>>, vector<16x128xf32>
    %c0_2 = arith.constant 0 : index
    %c0_3 = arith.constant 0 : index
    %4 = vector.load %arg3[%c0_2, %c0_3] : memref<16x128xbf16, #tpu.memory_space<vmem>>, vector<16x128xbf16>
    %c0_4 = arith.constant 0 : index
    %c0_5 = arith.constant 0 : index
    %5 = vector.load %arg4[%c0_4, %c0_5] : memref<128x128xbf16, #tpu.memory_space<vmem>>, vector<128x128xbf16>
    %cst = arith.constant dense<0.000000e+00> : vector<16x128xf32>
    %6 = tpu.matmul %4, %5, %cst {dimension_numbers = #tpu.dot_dimension_numbers<[1], [0], [0], [1], [0, 0, 1, 1], [], []>} : vector<16x128xbf16>, vector<128x128xbf16>, vector<16x128xf32> -> vector<16x128xf32>
    %7 = arith.addf %3, %6 : vector<16x128xf32>
    %c0_6 = arith.constant 0 : index
    %c0_7 = arith.constant 0 : index
    %8 = vector.load %arg7[%c0_6, %c0_7] : memref<16x128xf32, #tpu.memory_space<vmem>>, vector<16x128xf32>
    tpu.vector_store %arg7[%c0_6, %c0_7], %7 {strides = array<i32>} : memref<16x128xf32, #tpu.memory_space<vmem>>, vector<16x128xf32>,
    %c0_i32_8 = arith.constant 0 : i32
    %9 = arith.cmpi eq, %arg2, %c0_i32_8 : i32
    %10 = arith.extui %9 : i1 to i32
    %c0_i32_9 = arith.constant 0 : i32
    %11 = arith.cmpi ne, %10, %c0_i32_9 : i32
    scf.if %11 {
      %c0_10 = arith.constant 0 : index
      %c0_11 = arith.constant 0 : index
      %12 = vector.load %arg7[%c0_10, %c0_11] : memref<16x128xf32, #tpu.memory_space<vmem>>, vector<16x128xf32>
      %c0_12 = arith.constant 0 : index
      %c0_13 = arith.constant 0 : index
      %13 = vector.load %arg5[%c0_12, %c0_13] : memref<1x128xf32, #tpu.memory_space<vmem>>, vector<1x128xf32>
      %14 = vector.broadcast %13 : vector<1x128xf32> to vector<16x128xf32>
      %15 = arith.addf %12, %14 : vector<16x128xf32>
      %16 = arith.truncf %15 : vector<16x128xf32> to vector<16x128xbf16>
      %c0_14 = arith.constant 0 : index
      %c0_15 = arith.constant 0 : index
      %17 = vector.load %arg6[%c0_14, %c0_15] : memref<16x128xbf16, #tpu.memory_space<vmem>>, vector<16x128xbf16>
      tpu.vector_store %arg6[%c0_14, %c0_15], %16 {strides = array<i32>} : memref<16x128xbf16, #tpu.memory_space<vmem>>, vector<16x128xbf16>,
    } else {
    }
    return
  }
  func.func @transform_0(%arg0: i32, %arg1: i32, %arg2: i32) -> (i32, i32) {
    %c0_i32 = arith.constant 0 : i32
    return %arg0, %arg2 : i32, i32
  }
  func.func @transform_1(%arg0: i32, %arg1: i32, %arg2: i32) -> (i32, i32) {
    %c0_i32 = arith.constant 0 : i32
    return %arg2, %arg1 : i32, i32
  }
  func.func @transform_2(%arg0: i32, %arg1: i32, %arg2: i32) -> (i32, i32) {
    %c0_i32 = arith.constant 0 : i32
    %c0_i32_0 = arith.constant 0 : i32
    return %c0_i32, %arg1 : i32, i32
  }
  func.func @transform_3(%arg0: i32, %arg1: i32, %arg2: i32) -> (i32, i32) {
    %c0_i32 = arith.constant 0 : i32
    return %arg0, %arg1 : i32, i32
  }
}

</mosaic_0001>

<bundles_post_ra>
// kernel: tpu_custom_call.1
= control target key start
LH: loop header
LB: loop body
LE: loop exit
PB: predicated region body
PF: predicated region fallthrough
CT: control target
= control target key end

     0   :  { %8 = vsyncpa [#allocation4], 0  ;;  %s1060_s0 = inlined_call_operand.hbm [shape: bf16[16,128], index: 0, kind: input, shape index: {}]   ;;  %s1061_s1 = inlined_call_operand.hbm [shape: bf16[128,384], index: 1, kind: input, shape index: {}]   ;;  %s1062_s2 = inlined_call_operand.hbm [shape: f32[1,384], index: 2, kind: input, shape index: {}]   ;;  %s1063_s3 = inlined_call_operand.hbm [shape: bf16[16,384], index: 3, kind: output, shape index: {}]  }
   0x1   :  { %9 = vsyncpa [#allocation7], 0 }
   0x2   :  { %11 = vsyncpa [#allocation7 + $0x1], 0 }
   0x3   :  { %12 = vsyncpa [#allocation5], 0 }
   0x4   :  { %14 = vsyncpa [#allocation5 + $0x1], 0  ;;  %s885_s12 = smov 0   ;;  %s887_s13 = smov 0  }
   0x5   :  { %s889_s14 = smov 0   ;;  %s891_s15 = smov 0  }
   0x6   :  { %s893_s16 = smov 0   ;;  %s895_s17 = smov 0  }
   0x7 LB: > { %s35_s18 = sadd.s32 1, %s852_s16  ;;  %s76_s19 = sadd.s32 1, %s844_s14  ;;  %s856_s17 = sphi %s895_s17, %s20_s17   ;;  %s852_s16 = sphi %s893_s16, %s1074_s16   ;;  %s848_s15 = sphi %s891_s15, %s1073_s15   ;;  %s844_s14 = sphi %s889_s14, %s1072_s14   ;;  %s840_s13 = sphi %s887_s13, %s1071_s13   ;;  %s836_s12 = sphi %s885_s12, %s1070_s12  }
   0x8   : > { %p37_p0 = scmp.ge.s32.totalorder %s35_s18, 3  ;;  %p83_p1 = scmp.ne.s32.totalorder %s844_s14, %s840_s13 }
   0x9   : > { %p84_p2 = scmp.eq.s32.totalorder %s856_s17, 0  ;;  %p621_p5 = scmp.lt.s32.totalorder %s856_s17, 3 }
   0xa   : > { %s1076_s18 = smov (%p37_p0, %s35_s18), 0  ;;  %s185_s22 = sand.u32 1, %s856_s17  }
   0xb   : > { %p925_p3 = por %p84_p2, %p83_p1  ;;  %s72_s21 = ssub.s32 %s852_s16, %s1076_s18 }
   0xc   : > { %p74_p4 = scmp.eq.s32.totalorder %s72_s21, 0  ;;  %s187_s23 = sand.u32 1, %s844_s14  }
   0xd   : > { %s535_s25 = sshll.u32 %s187_s23, 6  ;;  %s536_s26 = sshll.u32 %s852_s16, 2 }
   0xe   : > { %s935_s24 = scalar_select %p74_p4, %s844_s14, %s76_s19  }
   0xf   : > { %s196_s29 = scalar_lea.hbm %s1061_s1, %s536_s26  ;;  %s189_s30 = scalar_lea.vmem [#allocation6], %s535_s25 }
  0x10   : > { %s199_s4 = sshll.u32 %s189_s30, 4  ;;  %s197_s5 = sshll.u32 %s196_s29, 4  ;;  %s200_s4 = int_to_ptr.vmem [resolvable:$true] %s199_s4  ;;  %s198_s5 = int_to_ptr.hbm [resolvable:$true] %s197_s5 }
  0x11   : > { %p945_p6 = pnand %p621_p5, %p925_p3  ;;  %s949_s7 = scalar_lea.sflag [#allocation7], %s185_s22 }
  0x12   : > { %s858_s8 = smov 192   ;;  %s859_s9 = smov 64  }
  0x13   : > { %s860_s10 = smov 4   ;;  %s957_s11 = sadd.s32 4294967295, %s856_s17  }
  0x14   : > { %612 = dma.hbm_to_vmem [thread:$0]  (!%p945_p6), %s198_s5, 1024, %s200_s4, %s949_s7, %s858_s8, %s859_s9, %s860_s10  }
  0x15   : > { %s531_s19 = sadd.s32 4294967294, %s856_s17   ;;  %p89_p7 = scmp.ne.s32.totalorder %s840_s13, %s836_s12 }
  0x16   : > { %p90_p8 = scmp.eq.s32.totalorder %s957_s11, 0  ;;  %p141_p9 = scmp.eq.s32.totalorder %s957_s11, 2 }
  0x17   : > { %p147_p10 = scmp.eq.s32.totalorder %s531_s19, 2  ;;  %p532_p12 = scmp.ge.s32.totalorder %s856_s17, 1 }
  0x18   : > { %p966_p11 = por %p90_p8, %p89_p7  ;;  %p974_p13 = por %p141_p9, %p83_p1 }
  0x19   : > { %p978_p0 = por %p147_p10, %p89_p7  ;;  %p154_p2 = scmp.lt.s32.totalorder %s856_s17, 4 }
  0x1a   : > { %s169_s27 = sshll.u32 %s1060_s0, 4  ;;  %s861_s29 = smov [#allocation3]   ;;  %s170_s27 = int_to_ptr.hbm [resolvable:$true] %s169_s27 }
  0x1b   : > { %p986_p3 = pnand %p532_p12, %p154_p2  ;;  %s171_s30 = sshll.u32 %s861_s29, 4  ;;  %s172_s30 = int_to_ptr.vmem [resolvable:$true] %s171_s30 }
  0x1c   : > { %s215_s8 = scalar_lea.hbm %s1062_s2, %s852_s16  ;;  %s212_s19 = scalar_lea.vmem [#allocation8], %s187_s23 }
  0x1d   : > { %p605_p1 = pneg %p986_p3  ;;  %s219_s25 = sshll.u32 %s212_s19, 4  ;;  %s220_s25 = int_to_ptr.vmem [resolvable:$true] %s219_s25 }
  0x1e   : > { %s217_s26 = sshll.u32 %s215_s8, 4  ;;  %228 = sbr.rel (%p986_p3) target bundleno = 215 (0xd7), region = 32  ;;  %s218_s26 = int_to_ptr.hbm [resolvable:$true] %s217_s26 }
  0x1f   : > { %p606_p4 = pnand %p605_p1, %p90_p8 }
  0x20   : > { %615 = dma.hbm_to_vmem [thread:$0]  (!%p945_p6), %s218_s26, 16, %s220_s25, %s949_s7  }
  0x21   : > { %608 = dma.hbm_to_vmem [thread:$0]  (!%p606_p4), %s170_s27, 128, %s172_s30, [#allocation4], %s859_s9, %s859_s9, %s860_s10  }
  0x23   : > { %823 = dma.done.wait (%p90_p8), [#allocation4], 128  }
  0x24   : > { %825 = vsyncadd (%p90_p8), [#allocation4], 4294967168  ;;  %s235_s23 = sand.u32 1, %s957_s11   ;;  %s1014_s29 = sand.u32 1, %s840_s13  }
  0x25   : > { %s539_s4 = sshll.u32 %s1014_s29, 6  ;;  %s236_s9 = scalar_lea.sflag [#allocation7], %s235_s23 }
  0x26   : > { %s239_s6 = scalar_lea.vmem [#allocation6], %s539_s4 }
  0x27   : > { %827 = dma.done.wait (%p966_p11), %s236_s9, 1040  }
  0x28   : > { %829 = vsyncadd (%p966_p11), %s236_s9, 4294966256  ;;  %v589_v0 = vld [vmem:[%s239_s6 + $0x38] sm:$0xff]  ;;  %v588_v1 = vld [vmem:[%s239_s6 + $0x30] sm:$0xff]  ;;  %s248_s7 = scalar_lea.vmem [#allocation8], %s1014_s29  ;;  %s540_s10 = sshll.u32 %s1014_s29, 3 }
  0x29   : > { %359 = vmatpush.bf16.msra.mxu0 %v589_v0  ;;  %v587_v2 = vld [vmem:[%s239_s6 + $0x28] sm:$0xff]  ;;  %v586_v3 = vld [vmem:[%s239_s6 + $0x20] sm:$0xff]  ;;  %v585_v4 = vld [vmem:[%s239_s6 + $0x18] sm:$0xff]  ;;  %s578_s11 = sshll.u32 %s848_s15, 2  ;;  %s275_s30 = scalar_lea.vmem [#allocation9], %s540_s10 }
  0x2a   : > { %v584_v5 = vld [vmem:[%s239_s6 + $0x10] sm:$0xff]  ;;  %v583_v6 = vld [vmem:[%s239_s6 + $0x8] sm:$0xff]  ;;  %v582_v7 = vld [vmem:[%s239_s6] sm:$0xff]  ;;  %s406_s28 = scalar_lea.hbm %s1063_s3, %s578_s11  ;;  %s407_s5 = sshll.u32 %s275_s30, 4  ;;  %s408_s5 = int_to_ptr.vmem [resolvable:$true] %s407_s5 }
  0x2b   : > { %v581_v8 = vld [vmem:[#allocation3] sm:$0xff]  ;;  %s409_s8 = sshll.u32 %s406_s28, 4  ;;  %s393_s19 = scalar_lea.sflag [#allocation5], %s1014_s29  ;;  %s410_s8 = int_to_ptr.hbm [resolvable:$true] %s409_s8 }
  0x2c   : > { %v679_v10 = vld [vmem:[%s248_s7] ss:$0 sm:$0xff]  ;;  %s784_s25 = sshra.s32 %s410_s8, 4  ;;  %s790_s4 = scalar_lea.hbm %s1063_s3, 24  ;;  %s785_s25 = int_to_ptr.hbm [resolvable:$true] %s784_s25 }
  0x2d   : > { %360 = vmatpush.bf16.msra.mxu0 %v588_v1  ;;  %s786_s15 = scalar_lea.hbm %s785_s25, 8  ;;  %p791_p8 = scmp.lt.s32.totalorder %s785_s25, %s1063_s3 }
  0x2e   : > { %p787_p5 = scmp.ne.s32.totalorder %s785_s25, %s786_s15  ;;  %p792_p9 = scmp.lt.s32.totalorder %s790_s4, %s786_s15 }
  0x30   : > { %p788_p6 = pnand %p787_p5, %p974_p13  ;;  %p793_p10 = por %p792_p9, %p791_p8 }
  0x31   : > { %361 = vmatpush.bf16.msra.mxu0 %v587_v2 }
  0x32   : > { %p789_p7 = pneg %p788_p6 }
  0x34   : > { %p794_p11 = pnand %p793_p10, %p789_p7 }
  0x35   : > { %362 = vmatpush.bf16.msra.mxu0 %v586_v3 }
  0x39   : > { %363 = vmatpush.bf16.msra.mxu0 %v585_v4 }
  0x3d   : > { %364 = vmatpush.bf16.msra.mxu0 %v584_v5 }
  0x41   : > { %365 = vmatpush.bf16.msra.mxu0 %v583_v6 }
  0x45   : > { %366 = vmatpush.bf16.msra.mxu0 %v582_v7 }
  0x48   : > { %367 = vmatmul.bf16.vlgmr.msra.gmra.mxu0 %v581_v8 }
  0xc5   : > { %v368_v9 = vpop.f32.mrf.mxu0 }
  0xc6   : > { %v386_v12 = vadd.f32 %v679_v10, %v368_v9 }
  0xcd   : > { %v370_v11 = vpop.f32.mrf.mxu0 }
  0xce   : > { %v387_v13 = vadd.f32 %v679_v10, %v370_v11 }
  0xd0   : > { %v593_v14 = vpack.c.bf16 %v387_v13, %v386_v12 }
  0xd2   : > { %594 = vst [vmem:[%s275_s30] sm:$0xff] %v593_v14  }
  0xd3   : > { %797 = shalt.err (!%p794_p11)
}
  0xd4   : > { %s862_s29 = smov 64   ;;  %s863_s7 = smov 192  }
  0xd5   : > { %s864_s10 = smov 4  }
  0xd6   : > { %603 = dma.vmem_to_hbm [thread:$0]  (%p974_p13), %s408_s5, 128, %s410_s8, %s393_s19, %s862_s29, %s863_s7, %s864_s10  }
  0xd7 PF: > { %p623_p12 = scmp.ge.s32.totalorder %s856_s17, 2  ;;  %s424_s11 = sand.u32 1, %s836_s12  }
  0xd8   : > { %s425_s20 = scalar_lea.sflag [#allocation5], %s424_s11 }
  0xd9   : > { %p617_p2 = pnand %p623_p12, %p978_p0 }
  0xdb   : > { %p618_p3 = pneg %p617_p2 }
  0xdd   : > { %831 = dma.done.wait (%p618_p3), %s425_s20, 128  }
  0xde   : > { %833 = vsyncadd (%p618_p3), %s425_s20, 4294967168  ;;  %s20_s17 = sadd.s32 1, %s856_s17   ;;  %s1070_s12 = smov %s840_s13 }
  0xdf   : > { %p17_p1 = scmp.ge.s32.totalorder %s20_s17, 5   ;;  %s1071_s13 = smov %s844_s14 }
  0xe0   : > { %s1072_s14 = smov %s935_s24  ;;  %s1073_s15 = smov %s852_s16 }
  0xe1   : > { %s1074_s16 = smov %s1076_s18  ;;  %19 = sbr.rel (!%p17_p1) target bundleno = 7 (0x7), region = 102 }
  0xe6   :  { %431 = vsyncpa [#allocation4], 1 }
  0xe7   :  { %433 = vsyncpa [#allocation4 + $0x1], 1 }
  0xe8   :  { %434 = vsyncpa [#allocation7], 1 }
  0xe9   :  { %436 = vsyncpa [#allocation7 + $0x1], 1 }
  0xea   :  { %437 = vsyncpa [#allocation5], 1 }
  0xeb   :  { %439 = vsyncpa [#allocation5 + $0x1], 1 }

</bundles_post_ra>
